<compile_context>
chip_gen: v7x
topology: tpu7x:2x2x1
jax: 0.10.0
libtpu: 0.0.40
codegen_flags: <defaults>
</compile_context>

<pallas_src>
import functools

import jax
import jax.numpy as jnp
from jax.experimental import pallas as pl
from jax.experimental.pallas import tpu as pltpu


def gresblock_kernel(x_ref, adj_ref, w1_ref, w1l_ref, b1_ref,
                     w2_ref, w2l_ref, b2_ref, out_ref,
                     *, use_activation, mxu_dtype):
    x = x_ref[0]                # (N, Cp)  f32 (kept wide for the residual epilogue)
    adj = adj_ref[...]          # (N, N)   already cast to mxu_dtype in the wrapper
    xm = x.astype(mxu_dtype)

    # ---- GConv 1:  h = adj @ (x @ W1) + x @ W1_loop + b1  (original association) ----
    s1 = jnp.dot(xm, w1_ref[...], preferred_element_type=jnp.float32)           # (N, Hp)
    h = (jnp.dot(adj, s1.astype(mxu_dtype), preferred_element_type=jnp.float32)
         + jnp.dot(xm, w1l_ref[...], preferred_element_type=jnp.float32)
         + b1_ref[...])
    if use_activation:
        h = jnp.maximum(h, 0.0)

    # ---- GConv 2:  y = adj @ (h @ W2) + h @ W2_loop + b2 ----
    hm = h.astype(mxu_dtype)
    s2 = jnp.dot(hm, w2_ref[...], preferred_element_type=jnp.float32)           # (N, Cp)
    y = (jnp.dot(adj, s2.astype(mxu_dtype), preferred_element_type=jnp.float32)
         + jnp.dot(hm, w2l_ref[...], preferred_element_type=jnp.float32)
         + b2_ref[...])
    if use_activation:
        y = jnp.maximum(y, 0.0)

    # ---- residual merge (f32 epilogue, single cast on store, lane-dense) ----
    out_ref[0] = ((x + y) * 0.5).astype(out_ref.dtype)


def _round_up(v, m):
    return ((v + m - 1) // m) * m


def _pad_axis(a, target, axis):
    pad = target - a.shape[axis]
    if pad == 0:
        return a
    widths = [(0, 0)] * a.ndim
    widths[axis] = (0, pad)
    return jnp.pad(a, widths)


def gresblock(x, adj, params, *, use_activation=True, mxu_dtype=jnp.float32):
    B, N, C = x.shape
    H = params["w1"].shape[1]

    # Lane-dense padding of feature/hidden dims to multiples of 128 (exact: padded
    # weight rows/cols and bias entries are zero, so padded output columns are zero).
    Cp = _round_up(C, 128)
    Hp = _round_up(H, 128)

    xp = _pad_axis(x, Cp, axis=2)                                    # (B, N, Cp)  f32
    adj_m = adj.astype(mxu_dtype)                                    # (N, N)
    w1 = _pad_axis(_pad_axis(params["w1"], Cp, 0), Hp, 1).astype(mxu_dtype)
    w1l = _pad_axis(_pad_axis(params["w1_loop"], Cp, 0), Hp, 1).astype(mxu_dtype)
    b1 = _pad_axis(params["b1"].reshape(1, H), Hp, 1)                # (1, Hp)  f32
    w2 = _pad_axis(_pad_axis(params["w2"], Hp, 0), Cp, 1).astype(mxu_dtype)
    w2l = _pad_axis(_pad_axis(params["w2_loop"], Hp, 0), Cp, 1).astype(mxu_dtype)
    b2 = _pad_axis(params["b2"].reshape(1, C), Cp, 1)                # (1, Cp)  f32

    kernel = functools.partial(gresblock_kernel,
                               use_activation=use_activation, mxu_dtype=mxu_dtype)

    out_p = pl.pallas_call(
        kernel,
        out_shape=jax.ShapeDtypeStruct((B, N, Cp), x.dtype),
        grid=(B,),
        in_specs=[
            pl.BlockSpec((1, N, Cp), lambda b: (b, 0, 0)),   # x  (per-batch block)
            pl.BlockSpec((N, N), lambda b: (0, 0)),          # adj (shared, grid-invariant)
            pl.BlockSpec((Cp, Hp), lambda b: (0, 0)),         # W1
            pl.BlockSpec((Cp, Hp), lambda b: (0, 0)),         # W1_loop
            pl.BlockSpec((1, Hp), lambda b: (0, 0)),          # b1
            pl.BlockSpec((Hp, Cp), lambda b: (0, 0)),         # W2
            pl.BlockSpec((Hp, Cp), lambda b: (0, 0)),         # W2_loop
            pl.BlockSpec((1, Cp), lambda b: (0, 0)),          # b2
        ],
        out_specs=pl.BlockSpec((1, N, Cp), lambda b: (b, 0, 0)),
        compiler_params=pltpu.CompilerParams(
            # Batch axis is independent -> sharded across TensorCores on v7x.
            dimension_semantics=("parallel",),
        ),
    )(xp, adj_m, w1, w1l, b1, w2, w2l, b2)

    return out_p[:, :, :C]


def gresblock_ref(x, adj, p, *, use_activation=True):
    """Pure-JAX reference mirroring the PyTorch forward."""
    hi = jax.lax.Precision.HIGHEST

    def gconv(z, w, wl, b):
        s = jnp.einsum("bnc,ch->bnh", z, w, precision=hi)
        s_loop = jnp.einsum("bnc,ch->bnh", z, wl, precision=hi)
        return jnp.einsum("nm,bmh->bnh", adj, s, precision=hi) + s_loop + b

    h = gconv(x, p["w1"], p["w1_loop"], p["b1"])
    if use_activation:
        h = jax.nn.relu(h)
    y = gconv(h, p["w2"], p["w2_loop"], p["b2"])
    if use_activation:
        y = jax.nn.relu(y)
    return (x + y) * 0.5


if __name__ == "__main__":
    B, N, IN_DIM, HIDDEN = 2, 32, 16, 32

    key = jax.random.PRNGKey(0)
    k_x, k_adj, k_w1, k_w1l, k_b1, k_w2, k_w2l, k_b2 = jax.random.split(key, 8)

    x = jax.random.normal(k_x, (B, N, IN_DIM), dtype=jnp.float32)

    # deterministic row-normalized symmetric adjacency with self loops
    a = (jax.random.uniform(k_adj, (N, N)) < 0.2).astype(jnp.float32)
    a = jnp.maximum(a, a.T) + jnp.eye(N, dtype=jnp.float32)
    adj = a / jnp.sum(a, axis=1, keepdims=True)

    params = {
        "w1": jax.random.normal(k_w1, (IN_DIM, HIDDEN), dtype=jnp.float32) * 0.1,
        "w1_loop": jax.random.normal(k_w1l, (IN_DIM, HIDDEN), dtype=jnp.float32) * 0.1,
        "b1": jax.random.normal(k_b1, (1, HIDDEN), dtype=jnp.float32) * 0.1,
        "w2": jax.random.normal(k_w2, (HIDDEN, IN_DIM), dtype=jnp.float32) * 0.1,
        "w2_loop": jax.random.normal(k_w2l, (HIDDEN, IN_DIM), dtype=jnp.float32) * 0.1,
        "b2": jax.random.normal(k_b2, (1, IN_DIM), dtype=jnp.float32) * 0.1,
    }

    ref = gresblock_ref(x, adj, params, use_activation=True)

    # f32 MXU operands (v5e path): tight tolerance vs. reference.
    out_f32 = jax.block_until_ready(
        gresblock(x, adj, params, use_activation=True, mxu_dtype=jnp.float32))
    assert out_f32.shape == (B, N, IN_DIM)
    assert jnp.allclose(out_f32, ref, atol=1e-4, rtol=1e-4), "f32 mismatch vs. reference"

    # bf16 MXU operands with f32 accumulation (v6e / v7x path): loose tolerance.
    out_bf16 = jax.block_until_ready(
        gresblock(x, adj, params, use_activation=True, mxu_dtype=jnp.bfloat16))
    assert out_bf16.shape == (B, N, IN_DIM)
    assert jnp.allclose(out_bf16, ref, atol=5e-2, rtol=5e-2), "bf16 mismatch vs. reference"

    print("KERNEL_OK")
</pallas_src>

<mosaic_0001>
module attributes {stable_mosaic.version = 11 : i64} {
  func.func @gresblock_kernel(%arg0: i32, %arg1: memref<1x32x128xf32, #tpu.memory_space<vmem>>, %arg2: memref<32x32xf32, #tpu.memory_space<vmem>>, %arg3: memref<128x128xf32, #tpu.memory_space<vmem>>, %arg4: memref<128x128xf32, #tpu.memory_space<vmem>>, %arg5: memref<1x128xf32, #tpu.memory_space<vmem>>, %arg6: memref<128x128xf32, #tpu.memory_space<vmem>>, %arg7: memref<128x128xf32, #tpu.memory_space<vmem>>, %arg8: memref<1x128xf32, #tpu.memory_space<vmem>>, %arg9: memref<1x32x128xf32, #tpu.memory_space<vmem>>) attributes {dimension_semantics = [#tpu.dimension_semantics<parallel>], iteration_bounds = array<i64: 2>, scalar_prefetch = 0 : i64, scratch_operands = 0 : i64, tpu.core_type = #tpu.core_type<tc>, window_params = [{transform_indices = @transform_0, window_bounds = array<i64: 1, 32, 128>}, {pipeline_mode = #tpu.pipeline_mode<synchronous>, transform_indices = @transform_1, window_bounds = array<i64: 32, 32>}, {pipeline_mode = #tpu.pipeline_mode<synchronous>, transform_indices = @transform_2, window_bounds = array<i64: 128, 128>}, {pipeline_mode = #tpu.pipeline_mode<synchronous>, transform_indices = @transform_3, window_bounds = array<i64: 128, 128>}, {pipeline_mode = #tpu.pipeline_mode<synchronous>, transform_indices = @transform_4, window_bounds = array<i64: 1, 128>}, {pipeline_mode = #tpu.pipeline_mode<synchronous>, transform_indices = @transform_5, window_bounds = array<i64: 128, 128>}, {pipeline_mode = #tpu.pipeline_mode<synchronous>, transform_indices = @transform_6, window_bounds = array<i64: 128, 128>}, {pipeline_mode = #tpu.pipeline_mode<synchronous>, transform_indices = @transform_7, window_bounds = array<i64: 1, 128>}, {transform_indices = @transform_8, window_bounds = array<i64: 1, 32, 128>}]} {
    %c0 = arith.constant 0 : index
    %c0_0 = arith.constant 0 : index
    %c0_1 = arith.constant 0 : index
    %0 = vector.load %arg1[%c0, %c0_0, %c0_1] : memref<1x32x128xf32, #tpu.memory_space<vmem>>, vector<1x32x128xf32>
    %1 = vector.shape_cast %0 : vector<1x32x128xf32> to vector<32x128xf32>
    %c0_2 = arith.constant 0 : index
    %c0_3 = arith.constant 0 : index
    %2 = vector.load %arg2[%c0_2, %c0_3] : memref<32x32xf32, #tpu.memory_space<vmem>>, vector<32x32xf32>
    %c0_4 = arith.constant 0 : index
    %c0_5 = arith.constant 0 : index
    %3 = vector.load %arg3[%c0_4, %c0_5] : memref<128x128xf32, #tpu.memory_space<vmem>>, vector<128x128xf32>
    %cst = arith.constant dense<0.000000e+00> : vector<32x128xf32>
    %4 = tpu.matmul %1, %3, %cst {dimension_numbers = #tpu.dot_dimension_numbers<[1], [0], [0], [1], [0, 0, 1, 1], [], []>} : vector<32x128xf32>, vector<128x128xf32>, vector<32x128xf32> -> vector<32x128xf32>
    %cst_6 = arith.constant dense<0.000000e+00> : vector<32x128xf32>
    %5 = tpu.matmul %2, %4, %cst_6 {dimension_numbers = #tpu.dot_dimension_numbers<[1], [0], [0], [1], [0, 0, 1, 1], [], []>} : vector<32x32xf32>, vector<32x128xf32>, vector<32x128xf32> -> vector<32x128xf32>
    %c0_7 = arith.constant 0 : index
    %c0_8 = arith.constant 0 : index
    %6 = vector.load %arg4[%c0_7, %c0_8] : memref<128x128xf32, #tpu.memory_space<vmem>>, vector<128x128xf32>
    %cst_9 = arith.constant dense<0.000000e+00> : vector<32x128xf32>
    %7 = tpu.matmul %1, %6, %cst_9 {dimension_numbers = #tpu.dot_dimension_numbers<[1], [0], [0], [1], [0, 0, 1, 1], [], []>} : vector<32x128xf32>, vector<128x128xf32>, vector<32x128xf32> -> vector<32x128xf32>
    %8 = arith.addf %5, %7 : vector<32x128xf32>
    %c0_10 = arith.constant 0 : index
    %c0_11 = arith.constant 0 : index
    %9 = vector.load %arg5[%c0_10, %c0_11] : memref<1x128xf32, #tpu.memory_space<vmem>>, vector<1x128xf32>
    %10 = vector.broadcast %9 : vector<1x128xf32> to vector<32x128xf32>
    %11 = arith.addf %8, %10 : vector<32x128xf32>
    %cst_12 = arith.constant 0.000000e+00 : f32
    %12 = vector.broadcast %cst_12 : f32 to vector<32x128xf32>
    %13 = arith.maximumf %11, %12 : vector<32x128xf32>
    %c0_13 = arith.constant 0 : index
    %c0_14 = arith.constant 0 : index
    %14 = vector.load %arg6[%c0_13, %c0_14] : memref<128x128xf32, #tpu.memory_space<vmem>>, vector<128x128xf32>
    %cst_15 = arith.constant dense<0.000000e+00> : vector<32x128xf32>
    %15 = tpu.matmul %13, %14, %cst_15 {dimension_numbers = #tpu.dot_dimension_numbers<[1], [0], [0], [1], [0, 0, 1, 1], [], []>} : vector<32x128xf32>, vector<128x128xf32>, vector<32x128xf32> -> vector<32x128xf32>
    %cst_16 = arith.constant dense<0.000000e+00> : vector<32x128xf32>
    %16 = tpu.matmul %2, %15, %cst_16 {dimension_numbers = #tpu.dot_dimension_numbers<[1], [0], [0], [1], [0, 0, 1, 1], [], []>} : vector<32x32xf32>, vector<32x128xf32>, vector<32x128xf32> -> vector<32x128xf32>
    %c0_17 = arith.constant 0 : index
    %c0_18 = arith.constant 0 : index
    %17 = vector.load %arg7[%c0_17, %c0_18] : memref<128x128xf32, #tpu.memory_space<vmem>>, vector<128x128xf32>
    %cst_19 = arith.constant dense<0.000000e+00> : vector<32x128xf32>
    %18 = tpu.matmul %13, %17, %cst_19 {dimension_numbers = #tpu.dot_dimension_numbers<[1], [0], [0], [1], [0, 0, 1, 1], [], []>} : vector<32x128xf32>, vector<128x128xf32>, vector<32x128xf32> -> vector<32x128xf32>
    %19 = arith.addf %16, %18 : vector<32x128xf32>
    %c0_20 = arith.constant 0 : index
    %c0_21 = arith.constant 0 : index
    %20 = vector.load %arg8[%c0_20, %c0_21] : memref<1x128xf32, #tpu.memory_space<vmem>>, vector<1x128xf32>
    %21 = vector.broadcast %20 : vector<1x128xf32> to vector<32x128xf32>
    %22 = arith.addf %19, %21 : vector<32x128xf32>
    %cst_22 = arith.constant 0.000000e+00 : f32
    %23 = vector.broadcast %cst_22 : f32 to vector<32x128xf32>
    %24 = arith.maximumf %22, %23 : vector<32x128xf32>
    %25 = arith.addf %1, %24 : vector<32x128xf32>
    %cst_23 = arith.constant 5.000000e-01 : f32
    %26 = vector.broadcast %cst_23 : f32 to vector<32x128xf32>
    %27 = arith.mulf %25, %26 : vector<32x128xf32>
    %c0_24 = arith.constant 0 : index
    %c0_25 = arith.constant 0 : index
    %c0_26 = arith.constant 0 : index
    %28 = vector.load %arg9[%c0_24, %c0_25, %c0_26] : memref<1x32x128xf32, #tpu.memory_space<vmem>>, vector<1x32x128xf32>
    %29 = vector.shape_cast %28 : vector<1x32x128xf32> to vector<32x128xf32>
    %30 = vector.shape_cast %27 : vector<32x128xf32> to vector<1x32x128xf32>
    tpu.vector_store %arg9[%c0_24, %c0_25, %c0_26], %30 {strides = array<i32>} : memref<1x32x128xf32, #tpu.memory_space<vmem>>, vector<1x32x128xf32>,
    return
  }
  func.func @transform_0(%arg0: i32) -> (i32, i32, i32) {
    %c0_i32 = arith.constant 0 : i32
    %c0_i32_0 = arith.constant 0 : i32
    %c0_i32_1 = arith.constant 0 : i32
    return %arg0, %c0_i32, %c0_i32_0 : i32, i32, i32
  }
  func.func @transform_1(%arg0: i32) -> (i32, i32) {
    %c0_i32 = arith.constant 0 : i32
    %c0_i32_0 = arith.constant 0 : i32
    %c0_i32_1 = arith.constant 0 : i32
    return %c0_i32, %c0_i32_0 : i32, i32
  }
  func.func @transform_2(%arg0: i32) -> (i32, i32) {
    %c0_i32 = arith.constant 0 : i32
    %c0_i32_0 = arith.constant 0 : i32
    %c0_i32_1 = arith.constant 0 : i32
    return %c0_i32, %c0_i32_0 : i32, i32
  }
  func.func @transform_3(%arg0: i32) -> (i32, i32) {
    %c0_i32 = arith.constant 0 : i32
    %c0_i32_0 = arith.constant 0 : i32
    %c0_i32_1 = arith.constant 0 : i32
    return %c0_i32, %c0_i32_0 : i32, i32
  }
  func.func @transform_4(%arg0: i32) -> (i32, i32) {
    %c0_i32 = arith.constant 0 : i32
    %c0_i32_0 = arith.constant 0 : i32
    %c0_i32_1 = arith.constant 0 : i32
    return %c0_i32, %c0_i32_0 : i32, i32
  }
  func.func @transform_5(%arg0: i32) -> (i32, i32) {
    %c0_i32 = arith.constant 0 : i32
    %c0_i32_0 = arith.constant 0 : i32
    %c0_i32_1 = arith.constant 0 : i32
    return %c0_i32, %c0_i32_0 : i32, i32
  }
  func.func @transform_6(%arg0: i32) -> (i32, i32) {
    %c0_i32 = arith.constant 0 : i32
    %c0_i32_0 = arith.constant 0 : i32
    %c0_i32_1 = arith.constant 0 : i32
    return %c0_i32, %c0_i32_0 : i32, i32
  }
  func.func @transform_7(%arg0: i32) -> (i32, i32) {
    %c0_i32 = arith.constant 0 : i32
    %c0_i32_0 = arith.constant 0 : i32
    %c0_i32_1 = arith.constant 0 : i32
    return %c0_i32, %c0_i32_0 : i32, i32
  }
  func.func @transform_8(%arg0: i32) -> (i32, i32, i32) {
    %c0_i32 = arith.constant 0 : i32
    %c0_i32_0 = arith.constant 0 : i32
    %c0_i32_1 = arith.constant 0 : i32
    return %arg0, %c0_i32, %c0_i32_0 : i32, i32, i32
  }
}

</mosaic_0001>

<bundles_post_ra>
// kernel: tpu_custom_call.1
= control target key start
LH: loop header
LB: loop body
LE: loop exit
PB: predicated region body
PF: predicated region fallthrough
CT: control target
= control target key end

     0   :  { %s2419_s0 = inlined_call_operand.hbm [shape: f32[2,32,128], index: 0, kind: input, shape index: {}]   ;;  %s2420_s1 = inlined_call_operand.hbm [shape: f32[32,32], index: 1, kind: input, shape index: {}]   ;;  %s2421_s2 = inlined_call_operand.hbm [shape: f32[128,128], index: 2, kind: input, shape index: {}]   ;;  %s2422_s3 = inlined_call_operand.hbm [shape: f32[128,128], index: 3, kind: input, shape index: {}]   ;;  %s2423_s4 = inlined_call_operand.vmem [shape: f32[1,128], index: 4, kind: input, shape index: {}]   ;;  %s2424_s5 = inlined_call_operand.hbm [shape: f32[128,128], index: 5, kind: input, shape index: {}]   ;;  %s2425_s6 = inlined_call_operand.hbm [shape: f32[128,128], index: 6, kind: input, shape index: {}]   ;;  %s2426_s7 = inlined_call_operand.vmem [shape: f32[1,128], index: 7, kind: input, shape index: {}]   ;;  %s2427_s8 = inlined_call_operand.hbm [shape: f32[2,32,128], index: 8, kind: output, shape index: {}]  }
   0x1   :  { %2432 = sst [smem:[#allocation19_spill]] %s2420_s1 }
   0x2   :  { %13 = vsyncpa [#allocation3], 0 }
   0x3   :  { %15 = vsyncpa [#allocation3 + $0x1], 0 }
   0x4   :  { %16 = vsyncpa [#allocation6], 0 }
   0x5   :  { %17 = vsyncpa [#allocation9], 0 }
   0x6   :  { %18 = vsyncpa [#allocation12], 0 }
   0x7   :  { %19 = vsyncpa [#allocation4], 0 }
   0x8   :  { %21 = vsyncpa [#allocation4 + $0x1], 0  ;;  %s2040_s27 = smov 0   ;;  %s2042_s28 = smov 0  }
   0x9   :  { %s2044_s29 = smov 0   ;;  %s2046_s30 = smov 0  }
   0xa LB: > { %s1984_s9 = smov [#allocation5]   ;;  %s2061_s11 = sadd.s32 4294967295, %s1982_s30   ;;  %s1982_s30 = sphi %s2046_s30, %s2456_s30   ;;  %s1978_s29 = sphi %s2044_s29, %s2455_s29   ;;  %s1974_s28 = sphi %s2042_s28, %s2454_s28   ;;  %s1970_s27 = sphi %s2040_s27, %s2453_s27  }
   0xb   : > { %s243_s10 = sshll.u32 %s1984_s9, 4  ;;  %p1170_p0 = scmp.ge.s32.totalorder %s1982_s30, 1  ;;  %s2066_s10 = int_to_ptr.vmem [resolvable:$true] %s243_s10 }
   0xc   : > { %p2428_p1 = scmp.eq.s32.totalorder %s2061_s11, 0  ;;  %p231_p2 = scmp.lt.s32.totalorder %s1982_s30, 3 }
   0xd   : > { %s1985_s13 = smov [#allocation8]   ;;  %s1986_s16 = smov [#allocation7]  }
   0xe   : > { %p2068_p3 = pnand %p1170_p0, %p231_p2  ;;  %s269_s14 = sshll.u32 %s1985_s13, 4  ;;  %s2081_s14 = int_to_ptr.vmem [resolvable:$true] %s269_s14 }
   0xf   : > { %s256_s17 = sshll.u32 %s1986_s16, 4  ;;  %s2435_s1 = sld [smem:[#allocation19_spill]]  ;;  %s2083_s17 = int_to_ptr.vmem [resolvable:$true] %s256_s17 }
  0x10   : > { %s2433_s12 = scalar_select %p2068_p3, 1, 0 }
  0x11   : > { %p1657_p5 = pneg %p2068_p3 }
  0x13   : > { %p2077_p6 = pnand %p1657_p5, %p2428_p1 }
  0x15   : > { %s1734_s20 = scalar_lea.hbm %s2435_s1, 512  ;;  %p2093_p8 = pneg %p2077_p6 }
  0x16   : > { %p1735_p7 = scmp.ne.s32.totalorder %s2435_s1, %s1734_s20  ;;  %p1741_p11 = scmp.lt.u32.totalorder %s1734_s20, %s2435_s1 }
  0x18   : > { %p1737_p9 = pnand %p2093_p8, %p1735_p7 }
  0x1a   : > { %p1738_p10 = pneg %p1737_p9 }
  0x1c   : > { %p1743_p12 = pnand %p1741_p11, %p1738_p10 }
  0x1e   : > { %1746 = shalt.err (!%p1743_p12)
}
  0x1f   : > { %s1747_s26 = scalar_lea.vmem %s2066_s10, 512  ;;  %p1755_p5 = scmp.lt.s32.totalorder %s2066_s10, %s2066_s10 }
  0x20   : > { %p1748_p13 = scmp.ne.s32.totalorder %s2066_s10, %s1747_s26  ;;  %p1756_p4 = scmp.lt.s32.totalorder %s1747_s26, %s1747_s26 }
  0x22   : > { %p1750_p0 = pnand %p1748_p13, %p2093_p8  ;;  %p1757_p7 = por %p1756_p4, %p1755_p5 }
  0x24   : > { %p1751_p2 = pneg %p1750_p0 }
  0x26   : > { %p1758_p9 = pnand %p1757_p7, %p1751_p2 }
  0x28   : > { %1761 = shalt.err (!%p1758_p9)
}
  0x29   : > { %s2430_s9 = smov 128   ;;  %s1988_s13 = smov 8  }
  0x2a   : > { %1660 = dma.hbm_to_vmem [thread:$0]  (!%p2077_p6), %s2435_s1, 512, %s2066_s10, [#allocation6], %s2430_s9, %s2430_s9, %s1988_s13  }
  0x2b   : > { %s1762_s21 = scalar_lea.hbm %s2422_s3, 2048 }
  0x2c   : > { %p1763_p4 = scmp.ne.s32.totalorder %s2422_s3, %s1762_s21  ;;  %p1769_p12 = scmp.lt.u32.totalorder %s1762_s21, %s2422_s3 }
  0x2e   : > { %p1765_p10 = pnand %p1763_p4, %p2093_p8 }
  0x30   : > { %p1766_p11 = pneg %p1765_p10 }
  0x32   : > { %p1771_p13 = pnand %p1769_p12, %p1766_p11 }
  0x34   : > { %1774 = shalt.err (!%p1771_p13)
}
  0x35   : > { %s1775_s10 = scalar_lea.vmem %s2081_s14, 2048  ;;  %p1783_p7 = scmp.lt.s32.totalorder %s2081_s14, %s2081_s14 }
  0x36   : > { %p1776_p0 = scmp.ne.s32.totalorder %s2081_s14, %s1775_s10  ;;  %p1784_p9 = scmp.lt.s32.totalorder %s1775_s10, %s1775_s10 }
  0x38   : > { %p1778_p2 = pnand %p1776_p0, %p2093_p8  ;;  %p1785_p4 = por %p1784_p9, %p1783_p7 }
  0x3a   : > { %p1779_p5 = pneg %p1778_p2 }
  0x3c   : > { %p1786_p10 = pnand %p1785_p4, %p1779_p5 }
  0x3e   : > { %1789 = shalt.err (!%p1786_p10)
}
  0x3f   : > { %1666 = dma.hbm_to_vmem [thread:$0]  (!%p2077_p6), %s2422_s3, 2048, %s2081_s14, [#allocation9], %s2430_s9, %s2430_s9, %s1988_s13  }
  0x40   : > { %s1790_s21 = scalar_lea.hbm %s2421_s2, 2048 }
  0x41   : > { %p1791_p11 = scmp.ne.s32.totalorder %s2421_s2, %s1790_s21  ;;  %p1797_p0 = scmp.lt.u32.totalorder %s1790_s21, %s2421_s2 }
  0x43   : > { %p1793_p12 = pnand %p1791_p11, %p2093_p8 }
  0x45   : > { %p1794_p13 = pneg %p1793_p12 }
  0x47   : > { %p1799_p2 = pnand %p1797_p0, %p1794_p13 }
  0x49   : > { %1802 = shalt.err (!%p1799_p2)
}
  0x4a   : > { %s1803_s14 = scalar_lea.vmem %s2083_s17, 2048  ;;  %p1811_p4 = scmp.lt.s32.totalorder %s2083_s17, %s2083_s17 }
  0x4b   : > { %p1804_p5 = scmp.ne.s32.totalorder %s2083_s17, %s1803_s14  ;;  %p1812_p10 = scmp.lt.s32.totalorder %s1803_s14, %s1803_s14 }
  0x4d   : > { %p1806_p7 = pnand %p1804_p5, %p2093_p8  ;;  %p1813_p11 = por %p1812_p10, %p1811_p4 }
  0x4f   : > { %p1807_p9 = pneg %p1806_p7 }
  0x51   : > { %p1814_p12 = pnand %p1813_p11, %p1807_p9 }
  0x53   : > { %1817 = shalt.err (!%p1814_p12)
}
  0x54   : > { %1663 = dma.hbm_to_vmem [thread:$0]  (!%p2077_p6), %s2421_s2, 2048, %s2083_s17, [#allocation6], %s2430_s9, %s2430_s9, %s1988_s13  }
  0x55   : > { %s1989_s18 = smov [#allocation10]   ;;  %s1990_s20 = smov [#allocation11]  }
  0x56   : > { %s285_s19 = sshll.u32 %s1989_s18, 4  ;;  %s298_s21 = sshll.u32 %s1990_s20, 4  ;;  %s286_s19 = int_to_ptr.vmem [resolvable:$true] %s285_s19  ;;  %s299_s21 = int_to_ptr.vmem [resolvable:$true] %s298_s21 }
  0x57   : > { %s1818_s25 = scalar_lea.hbm %s2424_s5, 2048 }
  0x58   : > { %p1819_p13 = scmp.ne.s32.totalorder %s2424_s5, %s1818_s25  ;;  %p1825_p5 = scmp.lt.u32.totalorder %s1818_s25, %s2424_s5 }
  0x5a   : > { %p1821_p0 = pnand %p1819_p13, %p2093_p8 }
  0x5c   : > { %p1822_p2 = pneg %p1821_p0 }
  0x5e   : > { %p1827_p7 = pnand %p1825_p5, %p1822_p2 }
  0x60   : > { %1830 = shalt.err (!%p1827_p7)
}
  0x61   : > { %s1831_s17 = scalar_lea.vmem %s286_s19, 2048  ;;  %p1839_p11 = scmp.lt.s32.totalorder %s286_s19, %s286_s19 }
  0x62   : > { %p1832_p9 = scmp.ne.s32.totalorder %s286_s19, %s1831_s17  ;;  %p1840_p12 = scmp.lt.s32.totalorder %s1831_s17, %s1831_s17 }
  0x64   : > { %p1834_p4 = pnand %p1832_p9, %p2093_p8  ;;  %p1841_p1 = por %p1840_p12, %p1839_p11 }
  0x66   : > { %p1835_p10 = pneg %p1834_p4 }
  0x68   : > { %p1842_p3 = pnand %p1841_p1, %p1835_p10 }
  0x6a   : > { %1845 = shalt.err (!%p1842_p3)
}
  0x6b   : > { %1669 = dma.hbm_to_vmem [thread:$0]  (!%p2077_p6), %s2424_s5, 2048, %s286_s19, [#allocation9], %s2430_s9, %s2430_s9, %s1988_s13  }
  0x6c   : > { %s1846_s22 = scalar_lea.hbm %s2425_s6, 2048 }
  0x6d   : > { %p1847_p1 = scmp.ne.s32.totalorder %s2425_s6, %s1846_s22  ;;  %p1853_p0 = scmp.lt.u32.totalorder %s1846_s22, %s2425_s6 }
  0x6f   : > { %p1849_p3 = pnand %p1847_p1, %p2093_p8 }
  0x71   : > { %p1850_p13 = pneg %p1849_p3 }
  0x73   : > { %p1855_p2 = pnand %p1853_p0, %p1850_p13 }
  0x75   : > { %1858 = shalt.err (!%p1855_p2)
}
  0x76   : > { %s1859_s10 = scalar_lea.vmem %s299_s21, 2048  ;;  %p1867_p4 = scmp.lt.s32.totalorder %s299_s21, %s299_s21 }
  0x77   : > { %p1860_p5 = scmp.ne.s32.totalorder %s299_s21, %s1859_s10  ;;  %p1868_p10 = scmp.lt.s32.totalorder %s1859_s10, %s1859_s10 }
  0x79   : > { %p1862_p7 = pnand %p1860_p5, %p2093_p8  ;;  %p1869_p11 = por %p1868_p10, %p1867_p4 }
  0x7b   : > { %p1863_p9 = pneg %p1862_p7 }
  0x7d   : > { %p1870_p12 = pnand %p1869_p11, %p1863_p9 }
  0x7f   : > { %1873 = shalt.err (!%p1870_p12)
}
  0x80   : > { %1672 = dma.hbm_to_vmem [thread:$0]  (!%p2077_p6), %s2425_s6, 2048, %s299_s21, [#allocation12], %s2430_s9, %s2430_s9, %s1988_s13  }
  0x81   : > { %s1169_s15 = sadd.s32 4294967294, %s1982_s30   ;;  %s2213_s23 = sadd.s32 1, %s1982_s30  }
  0x82   : > { %s34_s1 = sadd.s32 1, %s1978_s29  ;;  %s31_s16 = ssub.s32 %s1982_s30, %s2213_s23 }
  0x83   : > { %p41_p8 = scmp.ne.s32.totalorder %s1978_s29, %s1974_s28  ;;  %p32_p1 = scmp.eq.s32.totalorder %s31_s16, 0 }
  0x84   : > { %p42_p3 = scmp.eq.s32.totalorder %s1982_s30, 0  ;;  %p47_p13 = scmp.ne.s32.totalorder %s1974_s28, %s1970_s27 }
  0x85   : > { %p218_p0 = scmp.eq.s32.totalorder %s2061_s11, 1  ;;  %p2437_p5 = scmp.eq.s32.totalorder %s2061_s11, 0 }
  0x86   : > { %s2225_s18 = scalar_select %p32_p1, %s1978_s29, %s34_s1  }
  0x87   : > { %p43_p2 = por %p42_p3, %p41_p8  ;;  %p2229_p7 = por %p2437_p5, %p47_p13 }
  0x88   : > { %p2233_p6 = por %p218_p0, %p41_p8  ;;  %p224_p9 = scmp.eq.s32.totalorder %s1169_s15, 1 }
  0x89   : > { %p1686_p4 = scmp.lt.s32.totalorder %s1982_s30, 2  ;;  %s315_s22 = sand.u32 1, %s1978_s29  }
  0x8a   : > { %s2439_s21 = scalar_select %p2233_p6, 1, 0 }
  0x8b   : > { %p2239_p10 = por %p224_p9, %p47_p13  ;;  %s1177_s25 = sshll.u32 %s315_s22, 5 }
  0x8c   : > { %s1203_s26 = sshll.u32 %s1982_s30, 9  ;;  %s319_s17 = scalar_lea.vmem [#allocation2], %s1177_s25 }
  0x8d   : > { %s2440_s24 = scalar_select %p2239_p10, 1, 0 }
  0x8e   : > { %s2247_s19 = scalar_lea.hbm %s2419_s0, %s1203_s26  ;;  %s326_s1 = sshll.u32 %s319_s17, 4  ;;  %s2253_s1 = int_to_ptr.vmem [resolvable:$true] %s326_s1 }
  0x8f   : > { %p2249_p11 = pnand %p1686_p4, %p43_p2  ;;  %s2255_s16 = scalar_lea.sflag [#allocation3], %s315_s22 }
  0x90   : > { %s1874_s9 = scalar_lea.hbm %s2247_s19, 512  ;;  %s1879_s14 = scalar_lea.hbm %s2419_s0, 1024 }
  0x91   : > { %p1875_p12 = scmp.ne.s32.totalorder %s2247_s19, %s1874_s9  ;;  %p1876_p8 = pneg %p2249_p11 }
  0x92   : > { %p1880_p13 = scmp.lt.u32.totalorder %s2247_s19, %s2419_s0  ;;  %p1881_p0 = scmp.lt.u32.totalorder %s1879_s14, %s1874_s9 }
  0x93   : > { %p1877_p1 = pnand %p1876_p8, %p1875_p12  ;;  %p1883_p5 = scmp.lt.u32.totalorder %s1874_s9, %s2247_s19 }
  0x94   : > { %p1882_p2 = por %p1881_p0, %p1880_p13 }
  0x95   : > { %p1878_p3 = pneg %p1877_p1 }
  0x96   : > { %p1884_p9 = por %p1883_p5, %p1882_p2 }
  0x98   : > { %p1885_p4 = pnand %p1884_p9, %p1878_p3 }
  0x9a   : > { %1888 = shalt.err (!%p1885_p4)
}
  0x9b   : > { %s1889_s22 = scalar_lea.vmem %s2253_s1, 512  ;;  %s1991_s25 = smov [#allocation2]  }
  0x9c   : > { %p1890_p12 = scmp.ne.s32.totalorder %s2253_s1, %s1889_s22  ;;  %s1894_s26 = sshll.u32 %s1991_s25, 4  ;;  %s1895_s26 = int_to_ptr.vmem [resolvable:$false] %s1894_s26 }
  0x9d   : > { %s1896_s10 = scalar_lea.vmem %s1895_s26, 1024  ;;  %p1897_p6 = scmp.lt.s32.totalorder %s2253_s1, %s1895_s26 }
  0x9e   : > { %p1892_p1 = pnand %p1890_p12, %p1876_p8  ;;  %p1898_p13 = scmp.lt.s32.totalorder %s1896_s10, %s1889_s22 }
  0xa0   : > { %p1893_p10 = pneg %p1892_p1  ;;  %p1899_p0 = por %p1898_p13, %p1897_p6 }
  0xa2   : > { %p1900_p2 = pnand %p1899_p0, %p1893_p10 }
  0xa4   : > { %1903 = shalt.err (!%p1900_p2)
}
  0xa5   : > { %s2442_s9 = smov 128   ;;  %p2443_p8 = scmp.ne.s32.totalorder %s2433_s12, 0 }
  0xa6   : > { %1676 = dma.hbm_to_vmem [thread:$0]  (!%p2249_p11), %s2247_s19, 512, %s2253_s1, %s2255_s16, %s2442_s9, %s2442_s9, %s1988_s13  }
  0xa7   : > { %338 = sbr.rel (%p2443_p8) target bundleno = 1126 (0x466), region = 52  ;;  %s2289_s14 = sand.u32 (!%p2443_p8), 1, %s1974_s28  }
  0xa8   : > { %s1181_s17 = sshll.u32 (!%p2443_p8), %s2289_s14, 5  ;;  %s341_s22 = scalar_lea.sflag (!%p2443_p8), [#allocation3], %s2289_s14 }
  0xa9   : > { %s2295_s15 = scalar_lea.vmem (!%p2443_p8), [#allocation2], %s1181_s17 }
  0xae   : > { %1949 = dma.done.wait (%p2229_p7), %s341_s22, 512  }
  0xaf   : > { %1951 = vsyncadd (%p2229_p7), %s341_s22, 4294966784  ;;  %p2444_p6 = scmp.eq.s32.totalorder %s2061_s11, 0 }
  0xb1   : > { %1953 = dma.done.wait (%p2444_p6), [#allocation6], 2560   ;;  %p2445_p10 = pmov %p2444_p6 }
  0xb2   : > { %p2446_p11 = pmov %p2444_p6 }
  0xb3   : > { %1955 = vsyncadd (%p2445_p10), [#allocation6], 4294964736 }
  0xb4   : > { %1957 = dma.done.wait (%p2446_p11), [#allocation9], 4096   ;;  %p2447_p3 = pmov %p2444_p6 }
  0xb6   : > { %1959 = vsyncadd (%p2447_p3), [#allocation9], 4294963200  ;;  %p2448_p5 = pmov %p2447_p3 }
  0xb7   : > { %p2449_p9 = pmov %p2447_p3 }
  0xb8   : > { %1961 = dma.done.wait (%p2448_p5), [#allocation12], 2048  }
  0xb9   : > { %1963 = vsyncadd (%p2449_p9), [#allocation12], 4294965248  ;;  %v405_v0 = vld [vmem:[#allocation7] sm:$0xff]  ;;  %v406_v1 = vld [vmem:[#allocation7 + $0x8] sm:$0xff]  ;;  %vm607_vm0 = vcmask 261120   ;;  %s396_s1 = scalar_lea.vmem [#allocation13], %s1181_s17 }
  0xba   : > { %v407_v2 = vld [vmem:[#allocation7 + $0x10] sm:$0xff]  ;;  %v1481_v3 = vpack.c.bf16 %v406_v1, %v405_v0  ;;  %v408_v4 = vld [vmem:[#allocation7 + $0x18] sm:$0xff]  ;;  %v409_v6 = vld [vmem:[#allocation7 + $0x20] sm:$0xff]  ;;  %s1048_s16 = sshll.u32 %s396_s1, 4  ;;  %s1204_s25 = sshll.u32 %s2061_s11, 9  ;;  %s2369_s16 = int_to_ptr.vmem [resolvable:$true] %s1048_s16 }
  0xbb   : > { %v1485_v5 = vpack.c.bf16 %v408_v4, %v407_v2  ;;  %v410_v7 = vld [vmem:[#allocation7 + $0x28] sm:$0xff]  ;;  %v2314_v9 = vld [vmem:[%s2295_s15] sm:$0xff]  ;;  %v411_v10 = vld [vmem:[#allocation7 + $0x30] sm:$0xff]  ;;  %s2375_s9 = scalar_lea.hbm %s2427_s8, %s1204_s25  ;;  %s1035_s11 = scalar_lea.sflag [#allocation4], %s2289_s14 }
  0xbc   : > { %1482 = vmatprep.subr.bf16.mxu0 %v1481_v3  ;;  %v1489_v8 = vpack.c.bf16 %v410_v7, %v409_v6  ;;  %v412_v11 = vld [vmem:[#allocation7 + $0x38] sm:$0xff]  ;;  %1333 = vmatprep.mubr.f32.mxu0 %v2314_v9  ;;  %v506_v12 = vld [vmem:[#allocation8] sm:$0xff]  ;;  %v507_v13 = vld [vmem:[#allocation8 + $0x8] sm:$0xff]  ;;  %s1904_s17 = scalar_lea.vmem %s2369_s16, 512  ;;  %p2450_p4 = scmp.ne.s32.totalorder %s2439_s21, 0 }
  0xbd   : > { %1484 = vmatpush3.bf16.msra.mxu0 %v1481_v3  ;;  %1371 = vmatprep.mubr.f32.mxu1 %v2314_v9  ;;  %v508_v14 = vld [vmem:[#allocation8 + $0x10] sm:$0xff]  ;;  %v509_v15 = vld [vmem:[#allocation8 + $0x18] sm:$0xff]  ;;  %v1513_v16 = vpack.c.bf16 %v507_v13, %v506_v12  ;;  %v1493_v18 = vpack.c.bf16 %v412_v11, %v411_v10  ;;  %v510_v19 = vld [vmem:[#allocation8 + $0x20] sm:$0xff]  ;;  %p1905_p7 = scmp.ne.s32.totalorder %s2369_s16, %s1904_s17  ;;  %s1992_s22 = smov [#allocation13]  }
  0xbe   : > { %1486 = vmatprep.subr.bf16.mxu0 %v1485_v5  ;;  %v1517_v17 = vpack.c.bf16 %v509_v15, %v508_v14  ;;  %v511_v20 = vld [vmem:[#allocation8 + $0x28] sm:$0xff]  ;;  %v413_v21 = vld [vmem:[#allocation7 + $0x40] sm:$0xff]  ;;  %v512_v25 = vld [vmem:[#allocation8 + $0x30] sm:$0xff] }
  0xbf   : > { %v414_v22 = vld [vmem:[#allocation7 + $0x48] sm:$0xff]  ;;  %1514 = vmatprep.subr.bf16.mxu1 %v1513_v16  ;;  %v1521_v23 = vpack.c.bf16 %v511_v20, %v510_v19  ;;  %v513_v26 = vld [vmem:[#allocation8 + $0x38] sm:$0xff]  ;;  %v415_v27 = vld [vmem:[#allocation7 + $0x50] sm:$0xff]  ;;  %p1906_p12 = pnand %p1905_p7, %p2450_p4 }
  0xc0   : > { %1516 = vmatpush3.bf16.msra.mxu1 %v1513_v16  ;;  %v1497_v24 = vpack.c.bf16 %v414_v22, %v413_v21  ;;  %v416_v28 = vld [vmem:[#allocation7 + $0x58] sm:$0xff]  ;;  %v1525_v29 = vpack.c.bf16 %v513_v26, %v512_v25  ;;  %v514_v31 = vld [vmem:[#allocation8 + $0x40] sm:$0xff]  ;;  %v515_v32 = vld [vmem:[#allocation8 + $0x48] sm:$0xff] }
  0xc1   : > { %1488 = vmatpush3.bf16.msra.mxu0 %v1485_v5  ;;  %1518 = vmatprep.subr.bf16.mxu1 %v1517_v17  ;;  %v1501_v30 = vpack.c.bf16 %v416_v28, %v415_v27  ;;  %v417_v33 = vld [vmem:[#allocation7 + $0x60] sm:$0xff]  ;;  %v418_v34 = vld [vmem:[#allocation7 + $0x68] sm:$0xff]  ;;  %v1529_v35 = vpack.c.bf16 %v515_v32, %v514_v31  ;;  %v516_v37 = vld [vmem:[#allocation8 + $0x50] sm:$0xff]  ;;  %p1907_p1 = pneg %p1906_p12 }
  0xc2   : > { %1490 = vmatprep.subr.bf16.mxu0 %v1489_v8  ;;  %v1505_v36 = vpack.c.bf16 %v418_v34, %v417_v33  ;;  %v517_v38 = vld [vmem:[#allocation8 + $0x58] sm:$0xff]  ;;  %v419_v39 = vld [vmem:[#allocation7 + $0x70] sm:$0xff]  ;;  %v2319_v43 = vld [vmem:[%s2295_s15 + $0x8] sm:$0xff] }
  0xc3   : > { %v420_v40 = vld [vmem:[#allocation7 + $0x78] sm:$0xff]  ;;  %v1533_v41 = vpack.c.bf16 %v517_v38, %v516_v37  ;;  %v2322_v44 = vld [vmem:[%s2295_s15 + $0x10] sm:$0xff]  ;;  %v518_v46 = vld [vmem:[#allocation8 + $0x60] sm:$0xff] }
  0xc4   : > { %1520 = vmatpush3.bf16.msra.mxu1 %v1517_v17  ;;  %v1509_v42 = vpack.c.bf16 %v420_v40, %v419_v39  ;;  %v2327_v45 = vld [vmem:[%s2295_s15 + $0x18] sm:$0xff]  ;;  %v519_v47 = vld [vmem:[#allocation8 + $0x68] sm:$0xff]  ;;  %v520_v49 = vld [vmem:[#allocation8 + $0x70] sm:$0xff]  ;;  %s1908_s15 = sshll.u32 %s1992_s22, 4  ;;  %s1909_s15 = int_to_ptr.vmem [resolvable:$false] %s1908_s15 }
  0xc5   : > { %1492 = vmatpush3.bf16.msra.mxu0 %v1489_v8  ;;  %1522 = vmatprep.subr.bf16.mxu1 %v1521_v23  ;;  %v1537_v48 = vpack.c.bf16 %v519_v47, %v518_v46  ;;  %v521_v50 = vld [vmem:[#allocation8 + $0x78] sm:$0xff]  ;;  %v2330_v52 = vld [vmem:[#allocation5] sm:$0xff]  ;;  %v822_v54 = vld [vmem:[#allocation11 + $0x8] sm:$0xff]  ;;  %s1910_s12 = scalar_lea.vmem %s1909_s15, 1024  ;;  %p1911_p13 = scmp.lt.s32.totalorder %s2369_s16, %s1909_s15 }
  0xc6   : > { %1494 = vmatprep.subr.bf16.mxu0 %v1493_v18  ;;  %v1541_v51 = vpack.c.bf16 %v521_v50, %v520_v49  ;;  %v821_v53 = vld [vmem:[#allocation11] sm:$0xff]  ;;  %v823_v56 = vld [vmem:[#allocation11 + $0x10] sm:$0xff]  ;;  %v824_v57 = vld [vmem:[#allocation11 + $0x18] sm:$0xff]  ;;  %p1912_p0 = scmp.lt.s32.totalorder %s1910_s12, %s1904_s17 }
  0xc7   : > { %v1585_v55 = vpack.c.bf16 %v822_v54, %v821_v53  ;;  %v1589_v58 = vpack.c.bf16 %v824_v57, %v823_v56  ;;  %v825_v59 = vld [vmem:[#allocation11 + $0x20] sm:$0xff]  ;;  %v826_v60 = vld [vmem:[#allocation11 + $0x28] sm:$0xff]  ;;  %v827_v62 = vld [vmem:[#allocation11 + $0x30] sm:$0xff] }
  0xc8   : > { %1524 = vmatpush3.bf16.msra.mxu1 %v1521_v23  ;;  %v1593_v61 = vpack.c.bf16 %v826_v60, %v825_v59  ;;  %v828_v63 = vld [vmem:[#allocation11 + $0x38] sm:$0xff]  ;;  %v829_v1 = vld [vmem:[#allocation11 + $0x40] sm:$0xff]  ;;  %v830_v2 = vld [vmem:[#allocation11 + $0x48] sm:$0xff]  ;;  %p1913_p2 = por %p1912_p0, %p1911_p13 }
  0xc9   : > { %1496 = vmatpush3.bf16.msra.mxu0 %v1493_v18  ;;  %1526 = vmatprep.subr.bf16.mxu1 %v1525_v29  ;;  %v1597_v0 = vpack.c.bf16 %v828_v63, %v827_v62  ;;  %v1601_v3 = vpack.c.bf16 %v830_v2, %v829_v1  ;;  %v831_v4 = vld [vmem:[#allocation11 + $0x50] sm:$0xff]  ;;  %v832_v5 = vld [vmem:[#allocation11 + $0x58] sm:$0xff]  ;;  %v720_v11 = vld [vmem:[#allocation10] sm:$0xff] }
  0xca   : > { %1498 = vmatprep.subr.bf16.mxu0 %v1497_v24  ;;  %v1605_v6 = vpack.c.bf16 %v832_v5, %v831_v4  ;;  %v721_v12 = vld [vmem:[#allocation10 + $0x8] sm:$0xff]  ;;  %v722_v17 = vld [vmem:[#allocation10 + $0x10] sm:$0xff]  ;;  %v723_v18 = vld [vmem:[#allocation10 + $0x18] sm:$0xff]  ;;  %p1914_p8 = pnand %p1913_p2, %p1907_p1 }
  0xcb   : > { %v1553_v16 = vpack.c.bf16 %v721_v12, %v720_v11  ;;  %v2337_v19 = vld [vmem:[#allocation5 + $0x8] sm:$0xff]  ;;  %v2339_v20 = vld [vmem:[#allocation5 + $0x10] sm:$0xff]  ;;  %v1557_v21 = vpack.c.bf16 %v723_v18, %v722_v17  ;;  %v724_v22 = vld [vmem:[#allocation10 + $0x20] sm:$0xff] }
  0xcc   : > { %1528 = vmatpush3.bf16.msra.mxu1 %v1525_v29  ;;  %v725_v23 = vld [vmem:[#allocation10 + $0x28] sm:$0xff]  ;;  %v726_v26 = vld [vmem:[#allocation10 + $0x30] sm:$0xff]  ;;  %v727_v27 = vld [vmem:[#allocation10 + $0x38] sm:$0xff] }
  0xcd   : > { %1500 = vmatpush3.bf16.msra.mxu0 %v1497_v24  ;;  %1530 = vmatprep.subr.bf16.mxu1 %v1529_v35  ;;  %v2345_v24 = vld [vmem:[#allocation5 + $0x18] sm:$0xff]  ;;  %v1561_v25 = vpack.c.bf16 %v725_v23, %v724_v22  ;;  %v1565_v28 = vpack.c.bf16 %v727_v27, %v726_v26  ;;  %v728_v29 = vld [vmem:[#allocation10 + $0x40] sm:$0xff]  ;;  %v730_v32 = vld [vmem:[#allocation10 + $0x50] sm:$0xff] }
  0xce   : > { %1502 = vmatprep.subr.bf16.mxu0 %v1501_v30  ;;  %v731_v33 = vld [vmem:[#allocation10 + $0x58] sm:$0xff]  ;;  %v833_v37 = vld [vmem:[#allocation11 + $0x60] sm:$0xff]  ;;  %v834_v40 = vld [vmem:[#allocation11 + $0x68] sm:$0xff] }
  0xcf   : > { %v1573_v34 = vpack.c.bf16 %v731_v33, %v730_v32  ;;  %v734_v46 = vld [vmem:[#allocation10 + $0x70] sm:$0xff]  ;;  %v735_v47 = vld [vmem:[#allocation10 + $0x78] sm:$0xff]  ;;  %v1192_v56 = vld [vmem:[%s2423_s4] ss:$0 sm:$0xff] }
  0xd0   : > { %1532 = vmatpush3.bf16.msra.mxu1 %v1529_v35  ;;  %v732_v35 = vld [vmem:[#allocation10 + $0x60] sm:$0xff]  ;;  %v1581_v50 = vpack.c.bf16 %v735_v47, %v734_v46 }
  0xd1   : > { %1504 = vmatpush3.bf16.msra.mxu0 %v1501_v30  ;;  %1534 = vmatprep.subr.bf16.mxu1 %v1533_v41  ;;  %v729_v30 = vld [vmem:[#allocation10 + $0x48] sm:$0xff] }
  0xd2   : > { %1506 = vmatprep.subr.bf16.mxu0 %v1505_v36  ;;  %v1569_v31 = vpack.c.bf16 %v729_v30, %v728_v29 }
  0xd4   : > { %1536 = vmatpush3.bf16.msra.mxu1 %v1533_v41 }
  0xd5   : > { %1508 = vmatpush3.bf16.msra.mxu0 %v1505_v36  ;;  %1538 = vmatprep.subr.bf16.mxu1 %v1537_v48  ;;  %v733_v36 = vld [vmem:[#allocation10 + $0x68] sm:$0xff] }
  0xd6   : > { %1510 = vmatprep.subr.bf16.mxu0 %v1509_v42  ;;  %v1577_v39 = vpack.c.bf16 %v733_v36, %v732_v35 }
  0xd8   : > { %1540 = vmatpush3.bf16.msra.mxu1 %v1537_v48  ;;  %v835_v48 = vld [vmem:[#allocation11 + $0x70] sm:$0xff] }
  0xd9   : > { %1512 = vmatpush3.bf16.msra.mxu0 %v1509_v42  ;;  %1542 = vmatprep.subr.bf16.mxu1 %v1541_v51  ;;  %v1609_v42 = vpack.c.bf16 %v834_v40, %v833_v37 }
  0xdc   : > { %1334 = vmatmul.mubr.f32.vlgmr.msra.gmra.mrb[0].mxu0 %v2319_v43  ;;  %1544 = vmatpush3.bf16.msra.mxu1 %v1541_v51  ;;  %v836_v51 = vld [vmem:[#allocation11 + $0x78] sm:$0xff] }
  0xdd   : > { %1336 = vmatprep.mubr.f32.mxu0 %v2322_v44  ;;  %1586 = vmatprep.subr.bf16.mxu1 %v1585_v55  ;;  %v1613_v54 = vpack.c.bf16 %v836_v51, %v835_v48 }
  0xdf   : > { %1372 = vmatmul.mubr.f32.vlgmr.msra.gmra.mrb[0].mxu1 %v2319_v43 }
  0xe0   : > { %1337 = vmatmul.mubr.f32.gmra.mrb[2].mxu0 %v2327_v45  ;;  %1374 = vmatprep.mubr.f32.mxu1 %v2322_v44 }
  0xe1   : > { %1385 = vmatprep.mubr.msk.f32.mxu0 %vm607_vm0, %v2330_v52  ;;  %1588 = vmatpush3.bf16.msra.mxu1 %v1585_v55 }
  0xe2   : > { %1590 = vmatprep.subr.bf16.mxu1 %v1589_v58 }
  0xe3   : > { %1375 = vmatmul.mubr.f32.gmra.mrb[2].mxu1 %v2327_v45 }
  0xe5   : > { %1592 = vmatpush3.bf16.msra.mxu1 %v1589_v58 }
  0xe6   : > { %1594 = vmatprep.subr.bf16.mxu1 %v1593_v61 }
  0xe9   : > { %1596 = vmatpush3.bf16.msra.mxu1 %v1593_v61 }
  0xea   : > { %1598 = vmatprep.subr.bf16.mxu1 %v1597_v0 }
  0xed   : > { %1600 = vmatpush3.bf16.msra.mxu1 %v1597_v0 }
  0xee   : > { %1602 = vmatprep.subr.bf16.mxu1 %v1601_v3 }
  0xf1   : > { %1604 = vmatpush3.bf16.msra.mxu1 %v1601_v3 }
  0xf2   : > { %1606 = vmatprep.subr.bf16.mxu1 %v1605_v6 }
  0xf5   : > { %1608 = vmatpush3.bf16.msra.mxu1 %v1605_v6 }
  0xf6   : > { %1610 = vmatprep.subr.bf16.mxu1 %v1609_v42 }
  0xf9   : > { %1612 = vmatpush3.bf16.msra.mxu1 %v1609_v42 }
  0xfa   : > { %1614 = vmatprep.subr.bf16.mxu1 %v1613_v54 }
  0xfd   : > { %1616 = vmatpush3.bf16.msra.mxu1 %v1613_v54 }
 0x1af   : > { %v1335_v7 = vpop.f32.mrb[0].mxu0 }
 0x1b0   : > { %v487_v8 = vpop.f32.mrb[1].mxu0 }
 0x1b1   : > { %v1545_v10 = vpack.c.bf16 %v1335_v7, %v487_v8 }
 0x1b2   : > { %v1373_v38 = vpop.f32.mrb[0].mxu1 }
 0x1b3   : > { %v1338_v13 = vpop.f32.mrb[2].mxu0  ;;  %1546 = vmatprep.subr.bf16.mxu0 %v1545_v10  ;;  %v588_v41 = vpop.f32.mrb[1].mxu1 }
 0x1b4   : > { %v497_v14 = vpop.f32.mrb[3].mxu0  ;;  %1548 = vmatpush3.bf16.msra.mxu0 %v1545_v10 }
 0x1b5   : > { %v1549_v15 = vpack.c.bf16 %v1338_v13, %v497_v14 }
 0x1b6   : > { %v1376_v49 = vpop.f32.mrb[2].mxu1 }
 0x1b7   : > { %1550 = vmatprep.subr.bf16.mxu0 %v1549_v15  ;;  %v598_v53 = vpop.f32.mrb[3].mxu1 }
 0x1b8   : > { %1552 = vmatpush3.bf16.msra.mxu0 %v1549_v15 }
 0x1b9   : > { %1554 = vmatprep.subr.bf16.mxu0 %v1553_v16 }
 0x1bb   : > { %1386 = vmatmul.mubr.msk.f32.vlgmr.msra.gmra.mrb[4].mxu0 %vm607_vm0, %v2337_v19 }
 0x1bc   : > { %1388 = vmatprep.mubr.msk.f32.mxu0 %vm607_vm0, %v2339_v20  ;;  %1556 = vmatpush3.bf16.msra.mxu0 %v1553_v16 }
 0x1bd   : > { %1558 = vmatprep.subr.bf16.mxu0 %v1557_v21 }
 0x1bf   : > { %1389 = vmatmul.mubr.msk.f32.gmra.mrb[6].mxu0 %vm607_vm0, %v2345_v24 }
 0x1c0   : > { %1560 = vmatpush3.bf16.msra.mxu0 %v1557_v21 }
 0x1c1   : > { %1562 = vmatprep.subr.bf16.mxu0 %v1561_v25 }
 0x1c4   : > { %1564 = vmatpush3.bf16.msra.mxu0 %v1561_v25 }
 0x1c5   : > { %1566 = vmatprep.subr.bf16.mxu0 %v1565_v28 }
 0x1c8   : > { %1568 = vmatpush3.bf16.msra.mxu0 %v1565_v28 }
 0x1c9   : > { %1570 = vmatprep.subr.bf16.mxu0 %v1569_v31 }
 0x1cc   : > { %1572 = vmatpush3.bf16.msra.mxu0 %v1569_v31 }
 0x1cd   : > { %1574 = vmatprep.subr.bf16.mxu0 %v1573_v34 }
 0x1d0   : > { %1576 = vmatpush3.bf16.msra.mxu0 %v1573_v34 }
 0x1d1   : > { %1578 = vmatprep.subr.bf16.mxu0 %v1577_v39 }
 0x1d4   : > { %1580 = vmatpush3.bf16.msra.mxu0 %v1577_v39 }
 0x1d5   : > { %1582 = vmatprep.subr.bf16.mxu0 %v1581_v50 }
 0x1d8   : > { %1584 = vmatpush3.bf16.msra.mxu0 %v1581_v50 }
 0x28e   : > { %v1387_v55 = vpop.f32.mrb[4].mxu0 }
 0x28f   : > { %v692_v57 = vadd.f32 %v1387_v55, %v1373_v38  ;;  %v686_v58 = vpop.f32.mrb[5].mxu0 }
 0x290   : > { %v687_v59 = vadd.f32 %v686_v58, %v588_v41 }
 0x291   : > { %v713_v60 = vadd.f32 %v1192_v56, %v692_v57 }
 0x292   : > { %v712_v61 = vadd.f32 %v1192_v56, %v687_v59  ;;  %v1390_v62 = vpop.f32.mrb[6].mxu0 }
 0x293   : > { %v702_v63 = vadd.f32 %v1390_v62, %v1376_v49  ;;  %v696_v0 = vpop.f32.mrb[7].mxu0  ;;  %v717_v3 = vmax.f32 %v713_v60, 0.0 }
 0x294   : > { %v716_v1 = vmax.f32 %v712_v61, 0.0  ;;  %v697_v2 = vadd.f32 %v696_v0, %v598_v53 }
 0x295   : > { %v715_v4 = vadd.f32 %v1192_v56, %v702_v63 }
 0x296   : > { %v714_v5 = vadd.f32 %v1192_v56, %v697_v2  ;;  %1423 = vmatprep.mubr.f32.mxu0 %v716_v1  ;;  %1461 = vmatprep.mubr.f32.mxu1 %v716_v1 }
 0x297   : > { %1424 = vmatmul.mubr.f32.vlgmr.msra.gmra.mrb[8].mxu0 %v717_v3  ;;  %1462 = vmatmul.mubr.f32.vlgmr.msra.gmra.mrb[4].mxu1 %v717_v3  ;;  %v719_v7 = vmax.f32 %v715_v4, 0.0 }
 0x298   : > { %v718_v6 = vmax.f32 %v714_v5, 0.0 }
 0x29a   : > { %1426 = vmatprep.mubr.f32.mxu0 %v718_v6  ;;  %1464 = vmatprep.mubr.f32.mxu1 %v718_v6 }
 0x29b   : > { %1427 = vmatmul.mubr.f32.gmra.mrb[10].mxu0 %v719_v7  ;;  %1465 = vmatmul.mubr.f32.gmra.mrb[6].mxu1 %v719_v7 }
 0x29c   : > { %1475 = vmatprep.mubr.msk.f32.mxu1 %vm607_vm0, %v2330_v52  ;;  %v1197_v52 = vld [vmem:[%s2426_s7] ss:$0 sm:$0xff] }
 0x36a   : > { %v1425_v8 = vpop.f32.mrb[8].mxu0 }
 0x36b   : > { %v802_v10 = vpop.f32.mrb[9].mxu0 }
 0x36c   : > { %v1617_v11 = vpack.c.bf16 %v1425_v8, %v802_v10 }
 0x36e   : > { %v1428_v12 = vpop.f32.mrb[10].mxu0  ;;  %1618 = vmatprep.subr.bf16.mxu1 %v1617_v11 }
 0x36f   : > { %v812_v13 = vpop.f32.mrb[11].mxu0  ;;  %1620 = vmatpush3.bf16.msra.mxu1 %v1617_v11 }
 0x370   : > { %v1621_v14 = vpack.c.bf16 %v1428_v12, %v812_v13 }
 0x372   : > { %1622 = vmatprep.subr.bf16.mxu1 %v1621_v14 }
 0x373   : > { %1624 = vmatpush3.bf16.msra.mxu1 %v1621_v14 }
 0x376   : > { %1476 = vmatmul.mubr.msk.f32.vlgmr.msra.gmra.mrb[4].mxu1 %vm607_vm0, %v2337_v19 }
 0x377   : > { %1478 = vmatprep.mubr.msk.f32.mxu1 %vm607_vm0, %v2339_v20 }
 0x37a   : > { %1479 = vmatmul.mubr.msk.f32.gmra.mrb[6].mxu1 %vm607_vm0, %v2345_v24 }
 0x449   : > { %v1477_v15 = vpop.f32.mrb[4].mxu1 }
 0x44a   : > { %v1015_v16 = vadd.f32 %v1477_v15, %v1197_v52  ;;  %v988_v17 = vpop.f32.mrb[5].mxu1 }
 0x44b   : > { %v1014_v18 = vadd.f32 %v1197_v52, %v988_v17 }
 0x44c   : > { %v1019_v21 = vmax.f32 %v1015_v16, 0.0 }
 0x44d   : > { %v1018_v22 = vmax.f32 %v1014_v18, 0.0  ;;  %v1480_v23 = vpop.f32.mrb[6].mxu1 }
 0x44e   : > { %v1023_v19 = vadd.f32 %v1019_v21, %v2319_v43  ;;  %v1017_v25 = vadd.f32 %v1480_v23, %v1197_v52  ;;  %v998_v20 = vpop.f32.mrb[7].mxu1 }
 0x44f   : > { %v1022_v26 = vadd.f32 %v1018_v22, %v2314_v9  ;;  %v1016_v27 = vadd.f32 %v1197_v52, %v998_v20 }
 0x450   : > { %v1027_v24 = vmul.f32 0.5, %v1023_v19  ;;  %v1021_v28 = vmax.f32 %v1017_v25, 0.0 }
 0x451   : > { %v1026_v29 = vmul.f32 0.5, %v1022_v26  ;;  %v1020_v30 = vmax.f32 %v1016_v27, 0.0 }
 0x452   : > { %1031 = vst [vmem:[%s396_s1 + $0x8] sm:$0xff] %v1027_v24  ;;  %v1025_v31 = vadd.f32 %v1021_v28, %v2327_v45 }
 0x453   : > { %1030 = vst [vmem:[%s396_s1] sm:$0xff] %v1026_v29  ;;  %v1024_v9 = vadd.f32 %v1020_v30, %v2322_v44 }
 0x454   : > { %v1029_v43 = vmul.f32 0.5, %v1025_v31 }
 0x455   : > { %v1028_v32 = vmul.f32 0.5, %v1024_v9 }
 0x456   : > { %1033 = vst [vmem:[%s396_s1 + $0x18] sm:$0xff] %v1029_v43 }
 0x457   : > { %1032 = vst [vmem:[%s396_s1 + $0x10] sm:$0xff] %v1028_v32 }
 0x458   : > { %1917 = shalt.err (!%p1914_p8)
}
 0x459   : > { %s1918_s13 = scalar_lea.hbm %s2375_s9, 512  ;;  %s1922_s1 = scalar_lea.hbm %s2427_s8, 1024 }
 0x45a   : > { %p1919_p6 = scmp.ne.s32.totalorder %s2375_s9, %s1918_s13  ;;  %p1923_p3 = scmp.lt.u32.totalorder %s2375_s9, %s2427_s8 }
 0x45b   : > { %p1924_p5 = scmp.lt.u32.totalorder %s1922_s1, %s1918_s13  ;;  %p1926_p7 = scmp.lt.u32.totalorder %s1918_s13, %s2375_s9 }
 0x45c   : > { %p1920_p10 = pnand %p1919_p6, %p2450_p4 }
 0x45d   : > { %p1925_p9 = por %p1924_p5, %p1923_p3 }
 0x45e   : > { %p1921_p11 = pneg %p1920_p10 }
 0x45f   : > { %p1927_p12 = por %p1926_p7, %p1925_p9 }
 0x461   : > { %p1928_p1 = pnand %p1927_p12, %p1921_p11 }
 0x463   : > { %1931 = shalt.err (!%p1928_p1)
}
 0x464   : > { %s1993_s10 = smov 128   ;;  %s1994_s17 = smov 8  }
 0x465   : > { %1655 = dma.vmem_to_hbm [thread:$0]  (%p2450_p4), %s2369_s16, 512, %s2375_s9, %s1035_s11, %s1993_s10, %s1993_s10, %s1994_s17  }
 0x466 PF: > { %s1063_s22 = sand.u32 1, %s1970_s27   ;;  %p2451_p13 = scmp.ne.s32.totalorder %s2440_s24, 0 }
 0x467   : > { %p2452_p0 = scmp.ge.s32.totalorder %s1982_s30, 2  ;;  %s1064_s15 = scalar_lea.sflag [#allocation4], %s1063_s22 }
 0x469   : > { %p1678_p2 = pnand %p2452_p0, %p2451_p13 }
 0x46b   : > { %1965 = dma.done.wait (!%p1678_p2), %s1064_s15, 512  }
 0x46c   : > { %1967 = vsyncadd (!%p1678_p2), %s1064_s15, 4294966784  ;;  %p24_p8 = scmp.ge.s32.totalorder %s2213_s23, 4   ;;  %s2453_s27 = smov %s1974_s28 }
 0x46d   : > { %s2454_s28 = smov %s1978_s29  ;;  %s2455_s29 = smov %s2225_s18 }
 0x46e   : > { %s2456_s30 = smov %s2213_s23  ;;  %26 = sbr.rel (!%p24_p8) target bundleno = 10 (0xa), region = 117 }
 0x475   :  { %1069 = vsyncpa [#allocation3], 1 }
 0x476   :  { %1071 = vsyncpa [#allocation3 + $0x1], 1 }
 0x477   :  { %1072 = vsyncpa [#allocation6], 1 }
 0x478   :  { %1073 = vsyncpa [#allocation9], 1 }
 0x479   :  { %1074 = vsyncpa [#allocation12], 1 }
 0x47a   :  { %1075 = vsyncpa [#allocation4], 1 }
 0x47b   :  { %1077 = vsyncpa [#allocation4 + $0x1], 1 }

</bundles_post_ra>
